<compile_context>
chip_gen: v7x
topology: tpu7x:2x2x1
jax: 0.10.0
libtpu: 0.0.40
codegen_flags: <defaults>
</compile_context>

<pallas_src>
import functools

import jax
import jax.numpy as jnp
from jax.experimental import pallas as pl
from jax.experimental.pallas import tpu as pltpu

_NEG_SLOPE = 0.01   # torch.nn.functional.leaky_relu default negative_slope
_SCALE = 0.1

# ---------------------------------------------------------------------------
# Generation-aware VMEM budgeting
# ---------------------------------------------------------------------------
_FALLBACK_VMEM_CAPACITY = 64 * 1024 * 1024   # v7x physical VMEM (most restrictive)
_VMEM_HEADROOM = 16 * 1024 * 1024            # Mosaic internal scratch, semaphores, ...


@functools.lru_cache(maxsize=None)
def _vmem_capacity_bytes():
    try:
        cap = int(pltpu.get_tpu_info().vmem_capacity_bytes)
        if cap > 0:
            return cap
    except Exception:
        pass
    return _FALLBACK_VMEM_CAPACITY


@functools.lru_cache(maxsize=None)
def _scoped_vmem_limit():
    # <= 48 MiB on v7x (64 MiB physical), <= 96 MiB on v5e/v6e (128 MiB physical)
    return max(32 * 1024 * 1024,
               min(_vmem_capacity_bytes() - _VMEM_HEADROOM, 96 * 1024 * 1024))


def _tile_budget():
    # Working-set budget for one grid step, kept well under the scoped limit.
    return (3 * _scoped_vmem_limit()) // 4


def _pick_batch_tile(b, c, hw, itemsize, budget, target_steps=8):
    """Batch tile for the single-shot path; 0 means 'use the hw-tiled path'."""
    # Per batch element: 2x double-buffered input + 2x double-buffered output
    # (native dtype) + ~3 full-tile f32 intermediates inside the body.
    per_b = c * hw * (4 * itemsize + 3 * 4)
    bt_budget = budget // max(per_b, 1)
    if bt_budget < 1:
        return 0                              # one image does not fit -> hw tiling
    # Keep >= min(b, target_steps) grid steps: with a single grid step there is
    # no software pipelining at all, and on v7x one TensorCore would idle.
    bt_steps = max(1, b // target_steps)
    return max(1, min(b, bt_budget, bt_steps))


def _pick_hw_tile(hw, c, itemsize, budget, min_steps=4):
    """Lane-tile (multiple of 128) for the hw-tiled path."""
    per_s = c * (4 * itemsize + 3 * 4)
    t = max(128, (budget // max(per_s, 1)) // 128 * 128)
    # keep at least `min_steps` hw steps so the pipeline can double-buffer
    cap = max(128, ((pl.cdiv(hw, min_steps) + 127) // 128) * 128)
    return min(t, cap)


# ---------------------------------------------------------------------------
# Path 1: whole (batch-tile, c, hw) block fits in VMEM
# ---------------------------------------------------------------------------
def _bab_kernel(x_ref, w_ref, o_ref):
    # x_ref: (BT, C, HW)   w_ref: (1, C, 1)   o_ref: (BT, C, HW)
    x = x_ref[...]                                       # native dtype, no f32 copy
    wv = w_ref[...].astype(jnp.float32)                  # (1, C, 1)

    # logits[b, s] = sum_c w[c] * x[b, c, s]  (promotes to f32 inside the product)
    logits = jnp.sum(x * wv, axis=1, keepdims=True)      # (BT, 1, HW) f32, lane-dense
    # Linear bias intentionally omitted: softmax(z + b) == softmax(z).

    # numerically-stable softmax over the spatial (lane) axis, normalization deferred
    m = jnp.max(logits, axis=2, keepdims=True)           # (BT, 1, 1)
    e = jnp.exp(logits - m)                               # (BT, 1, HW)
    denom = jnp.sum(e, axis=2, keepdims=True)             # (BT, 1, 1)

    num = jnp.sum(x * e, axis=2, keepdims=True)           # (BT, C, 1) f32
    weighted = num * pl.reciprocal(denom, approx=False)   # exact: keep 1e-5 tol

    lrelu = jnp.where(weighted > 0, weighted, _NEG_SLOPE * weighted)
    # broadcast add in the native dtype (no full-tile f32 output temporary)
    o_ref[...] = x + (_SCALE * lrelu).astype(o_ref.dtype)


def _run_batch_tiled(x, w3, bt, vmem_limit):
    b, c, hw = x.shape
    grid_b = pl.cdiv(b, bt)                 # padded last block is safe (rows dropped)
    return pl.pallas_call(
        _bab_kernel,
        out_shape=jax.ShapeDtypeStruct((b, c, hw), x.dtype),
        grid_spec=pltpu.PrefetchScalarGridSpec(
            num_scalar_prefetch=0,
            grid=(grid_b,),
            in_specs=[
                pl.BlockSpec((bt, c, hw), lambda i: (i, 0, 0)),
                pl.BlockSpec((1, c, 1), lambda i: (0, 0, 0)),
            ],
            out_specs=pl.BlockSpec((bt, c, hw), lambda i: (i, 0, 0)),
        ),
        compiler_params=pltpu.CompilerParams(
            dimension_semantics=("parallel",),
            vmem_limit_bytes=vmem_limit,
        ),
    )(x, w3)


# ---------------------------------------------------------------------------
# Path 2: hw-tiled online-softmax (large feature maps)
# ---------------------------------------------------------------------------
def _bab_reduce_kernel(x_ref, w_ref, add_ref, m_sc, l_sc, num_sc, *, hw):
    # Grid = (batch, hw_tiles); hw axis is a reduction ("arbitrary", innermost).
    # x_ref: (1, C, THW)  w_ref: (1, C, 1)  add_ref: (1, C, 1) f32 output
    j = pl.program_id(1)
    thw = x_ref.shape[2]

    @pl.when(j == 0)
    def _():
        m_sc[...] = jnp.full(m_sc.shape, -jnp.inf, jnp.float32)
        l_sc[...] = jnp.zeros(l_sc.shape, jnp.float32)
        num_sc[...] = jnp.zeros(num_sc.shape, jnp.float32)

    wv = w_ref[...].astype(jnp.float32)                              # (1, C, 1)

    # mask padded lanes of the ragged last tile
    lane = jax.lax.broadcasted_iota(jnp.int32, (1, 1, thw), 2) + j * thw
    valid = lane < hw                                                # (1, 1, THW)

    x32 = jnp.where(valid, x_ref[...].astype(jnp.float32), 0.0)      # (1, C, THW)
    logits = jnp.sum(x32 * wv, axis=1, keepdims=True)                # (1, 1, THW)
    logits = jnp.where(valid, logits, -jnp.inf)

    m_new = jnp.maximum(m_sc[...], jnp.max(logits, axis=2, keepdims=True))
    alpha = jnp.exp(m_sc[...] - m_new)                               # (1, 1, 1)
    e = jnp.exp(logits - m_new)                                      # padded lanes -> 0
    l_sc[...] = alpha * l_sc[...] + jnp.sum(e, axis=2, keepdims=True)
    num_sc[...] = alpha * num_sc[...] + jnp.sum(x32 * e, axis=2, keepdims=True)
    m_sc[...] = m_new

    @pl.when(j == pl.num_programs(1) - 1)
    def _():
        weighted = num_sc[...] * pl.reciprocal(l_sc[...], approx=False)
        lrelu = jnp.where(weighted > 0, weighted, _NEG_SLOPE * weighted)
        add_ref[...] = (_SCALE * lrelu).astype(add_ref.dtype)


def _bab_add_kernel(x_ref, add_ref, o_ref):
    # x_ref: (1, C, THW)  add_ref: (1, C, 1) f32  o_ref: (1, C, THW)
    o_ref[...] = (x_ref[...] + add_ref[...]).astype(o_ref.dtype)


def _run_hw_tiled(x, w3, vmem_limit, hw_tile=None):
    b, c, hw = x.shape
    itemsize = jnp.dtype(x.dtype).itemsize
    if hw_tile is None:
        hw_tile = _pick_hw_tile(hw, c, itemsize, _tile_budget())
    n_hw = pl.cdiv(hw, hw_tile)

    # Pass 1: per-image 0.1 * leaky_relu(attention-weighted channel vector)
    add = pl.pallas_call(
        functools.partial(_bab_reduce_kernel, hw=hw),
        out_shape=jax.ShapeDtypeStruct((b, c, 1), jnp.float32),
        grid_spec=pltpu.PrefetchScalarGridSpec(
            num_scalar_prefetch=0,
            grid=(b, n_hw),
            in_specs=[
                pl.BlockSpec((1, c, hw_tile), lambda i, j: (i, 0, j)),
                pl.BlockSpec((1, c, 1), lambda i, j: (0, 0, 0)),
            ],
            out_specs=pl.BlockSpec((1, c, 1), lambda i, j: (i, 0, 0)),
            scratch_shapes=[
                pltpu.VMEM((1, 1, 1), jnp.float32),    # running max
                pltpu.VMEM((1, 1, 1), jnp.float32),    # running denom
                pltpu.VMEM((1, c, 1), jnp.float32),    # running weighted sum
            ],
        ),
        compiler_params=pltpu.CompilerParams(
            dimension_semantics=("parallel", "arbitrary"),
            vmem_limit_bytes=vmem_limit,
        ),
    )(x, w3)

    # Pass 2: streaming broadcast add  out = x + add
    return pl.pallas_call(
        _bab_add_kernel,
        out_shape=jax.ShapeDtypeStruct((b, c, hw), x.dtype),
        grid_spec=pltpu.PrefetchScalarGridSpec(
            num_scalar_prefetch=0,
            grid=(b, n_hw),
            in_specs=[
                pl.BlockSpec((1, c, hw_tile), lambda i, j: (i, 0, j)),
                pl.BlockSpec((1, c, 1), lambda i, j: (i, 0, 0)),
            ],
            out_specs=pl.BlockSpec((1, c, hw_tile), lambda i, j: (i, 0, j)),
        ),
        compiler_params=pltpu.CompilerParams(
            dimension_semantics=("parallel", "parallel"),
            vmem_limit_bytes=vmem_limit,
        ),
    )(x, add)


# ---------------------------------------------------------------------------
# Public API
# ---------------------------------------------------------------------------
def background_attenuation_level(feat_nchw, weight, bias=None, *, hw_tile=None):
    """One feature level.  feat_nchw: (b, c, h, w); weight: (1, c); bias: (1,).

    `hw_tile` forces the hw-tiled online-softmax path (mainly for testing)."""
    del bias  # softmax is shift-invariant; the Linear bias is a mathematical no-op
    b, c, h, w = feat_nchw.shape
    hw = h * w

    x = feat_nchw.reshape(b, c, hw)                   # layout-preserving, no copy
    w3 = weight.reshape(1, c, 1).astype(jnp.float32)

    vmem_limit = _scoped_vmem_limit()
    itemsize = jnp.dtype(feat_nchw.dtype).itemsize

    if hw_tile is not None:
        out = _run_hw_tiled(x, w3, vmem_limit, hw_tile=hw_tile)
    else:
        bt = _pick_batch_tile(b, c, hw, itemsize, _tile_budget())
        if bt >= 1:
            out = _run_batch_tiled(x, w3, bt, vmem_limit)
        else:
            out = _run_hw_tiled(x, w3, vmem_limit)

    return out.reshape(b, c, h, w)


def background_attenuation_block(features, weights, biases):
    """features: list of NCHW arrays; weights[i]: (1, c); biases[i]: (1,)."""
    return [background_attenuation_level(f, w, b)
            for f, w, b in zip(features, weights, biases)]


# ---------------------------------------------------------------------------
# Pure-JAX reference (mirrors the PyTorch forward, including the bias)
# ---------------------------------------------------------------------------
def _reference_level(feat, weight, bias):
    b, c, h, w = feat.shape
    x = jnp.transpose(feat.reshape(b, c, h * w), (0, 2, 1))        # (b, hw, c)
    logits = jnp.einsum("bnc,c->bn", x, weight[0]) + bias[0]       # (b, hw)
    attn = jax.nn.softmax(logits, axis=1)[..., None]               # (b, hw, 1)
    weighted = jnp.einsum("bnc,bno->boc", x, attn)                 # (b, 1, c)
    lrelu = jnp.where(weighted > 0, weighted, _NEG_SLOPE * weighted)
    out = x + _SCALE * lrelu
    return jnp.transpose(out, (0, 2, 1)).reshape(b, c, h, w)


if __name__ == "__main__":
    key = jax.random.PRNGKey(0)

    n_level = 2
    in_features = 32          # channel count c == Linear in_features
    batch = 2
    spatials = [(16, 16), (8, 8)]   # per-level spatial sizes (level 0 lane-dense)

    keys = jax.random.split(key, 3 * n_level + 3)
    features, weights, biases = [], [], []
    for lvl, (h, w) in enumerate(spatials):
        features.append(jax.random.normal(
            keys[lvl], (batch, in_features, h, w), dtype=jnp.float32))
        # deterministic "Linear(in_features, 1)" params (synthetic, no checkpoint)
        weights.append(0.1 * jax.random.normal(
            keys[n_level + lvl], (1, in_features), dtype=jnp.float32))
        biases.append(0.1 * jax.random.normal(
            keys[2 * n_level + lvl], (1,), dtype=jnp.float32))

    outs = background_attenuation_block(features, weights, biases)
    outs = [jax.block_until_ready(o) for o in outs]

    for o, f, wgt, bia in zip(outs, features, weights, biases):
        ref = _reference_level(f, wgt, bia)
        assert o.shape == f.shape
        assert jnp.allclose(o, ref, atol=1e-5, rtol=1e-5), "mismatch vs reference"

    # Also exercise the hw-tiled online-softmax path (forced small lane tile,
    # ragged hw = 18*20 = 360 -> 3 tiles of 128 with a masked tail).
    h2, w2, c2 = 18, 20, 8
    f2 = jax.random.normal(keys[-3], (batch, c2, h2, w2), dtype=jnp.float32)
    wgt2 = 0.1 * jax.random.normal(keys[-2], (1, c2), dtype=jnp.float32)
    bia2 = 0.1 * jax.random.normal(keys[-1], (1,), dtype=jnp.float32)
    o2 = jax.block_until_ready(
        background_attenuation_level(f2, wgt2, bia2, hw_tile=128))
    ref2 = _reference_level(f2, wgt2, bia2)
    assert o2.shape == f2.shape
    assert jnp.allclose(o2, ref2, atol=1e-5, rtol=1e-5), "hw-tiled path mismatch"

    print("KERNEL_OK")
</pallas_src>

<mosaic_0001>
module attributes {stable_mosaic.version = 11 : i64} {
  func.func @_bab_kernel(%arg0: i32, %arg1: memref<1x32x256xf32, #tpu.memory_space<vmem>>, %arg2: memref<1x32x1xf32, #tpu.memory_space<vmem>>, %arg3: memref<1x32x256xf32, #tpu.memory_space<vmem>>) attributes {dimension_semantics = [#tpu.dimension_semantics<parallel>], iteration_bounds = array<i64: 2>, scalar_prefetch = 0 : i64, scratch_operands = 0 : i64, tpu.core_type = #tpu.core_type<tc>, window_params = [{transform_indices = @transform_0, window_bounds = array<i64: 1, 32, 256>}, {pipeline_mode = #tpu.pipeline_mode<synchronous>, transform_indices = @transform_1, window_bounds = array<i64: 1, 32, 1>}, {transform_indices = @transform_2, window_bounds = array<i64: 1, 32, 256>}]} {
    %c0 = arith.constant 0 : index
    %c0_0 = arith.constant 0 : index
    %c0_1 = arith.constant 0 : index
    %0 = vector.load %arg1[%c0, %c0_0, %c0_1] : memref<1x32x256xf32, #tpu.memory_space<vmem>>, vector<1x32x256xf32>
    %c0_2 = arith.constant 0 : index
    %c0_3 = arith.constant 0 : index
    %c0_4 = arith.constant 0 : index
    %1 = vector.load %arg2[%c0_2, %c0_3, %c0_4] : memref<1x32x1xf32, #tpu.memory_space<vmem>>, vector<1x32x1xf32>
    %2 = vector.broadcast %1 : vector<1x32x1xf32> to vector<1x32x256xf32>
    %3 = arith.mulf %0, %2 : vector<1x32x256xf32>
    %cst = arith.constant dense<0.000000e+00> : vector<1x256xf32>
    %4 = vector.multi_reduction <add>, %3, %cst [1] : vector<1x32x256xf32> to vector<1x256xf32>
    %5 = vector.shape_cast %4 : vector<1x256xf32> to vector<1x1x256xf32>
    %cst_5 = arith.constant dense<0xFF800000> : vector<1x1xf32>
    %6 = vector.multi_reduction <maximumf>, %5, %cst_5 [2] : vector<1x1x256xf32> to vector<1x1xf32>
    %7 = vector.shape_cast %6 : vector<1x1xf32> to vector<1x1x1xf32>
    %8 = vector.broadcast %7 : vector<1x1x1xf32> to vector<1x1x256xf32>
    %9 = arith.subf %5, %8 : vector<1x1x256xf32>
    %10 = math.exp %9 : vector<1x1x256xf32>
    %cst_6 = arith.constant dense<0.000000e+00> : vector<1x1xf32>
    %11 = vector.multi_reduction <add>, %10, %cst_6 [2] : vector<1x1x256xf32> to vector<1x1xf32>
    %12 = vector.shape_cast %11 : vector<1x1xf32> to vector<1x1x1xf32>
    %13 = vector.broadcast %10 : vector<1x1x256xf32> to vector<1x32x256xf32>
    %14 = arith.mulf %0, %13 : vector<1x32x256xf32>
    %cst_7 = arith.constant dense<0.000000e+00> : vector<1x32xf32>
    %15 = vector.multi_reduction <add>, %14, %cst_7 [2] : vector<1x32x256xf32> to vector<1x32xf32>
    %16 = vector.shape_cast %15 : vector<1x32xf32> to vector<1x32x1xf32>
    %17 = tpu.reciprocal %12 : vector<1x1x1xf32> -> vector<1x1x1xf32>
    %18 = vector.broadcast %17 : vector<1x1x1xf32> to vector<1x32x1xf32>
    %19 = arith.mulf %16, %18 : vector<1x32x1xf32>
    %cst_8 = arith.constant 0.000000e+00 : f32
    %20 = vector.broadcast %cst_8 : f32 to vector<1x32x1xf32>
    %21 = arith.cmpf ogt, %19, %20 : vector<1x32x1xf32>
    %cst_9 = arith.constant 0.00999999977 : f32
    %22 = vector.broadcast %cst_9 : f32 to vector<1x32x1xf32>
    %23 = arith.mulf %22, %19 : vector<1x32x1xf32>
    %24 = arith.select %21, %19, %23 : vector<1x32x1xi1>, vector<1x32x1xf32>
    %cst_10 = arith.constant 1.000000e-01 : f32
    %25 = vector.broadcast %cst_10 : f32 to vector<1x32x1xf32>
    %26 = arith.mulf %25, %24 : vector<1x32x1xf32>
    %27 = vector.broadcast %26 : vector<1x32x1xf32> to vector<1x32x256xf32>
    %28 = arith.addf %0, %27 : vector<1x32x256xf32>
    %c0_11 = arith.constant 0 : index
    %c0_12 = arith.constant 0 : index
    %c0_13 = arith.constant 0 : index
    %29 = vector.load %arg3[%c0_11, %c0_12, %c0_13] : memref<1x32x256xf32, #tpu.memory_space<vmem>>, vector<1x32x256xf32>
    tpu.vector_store %arg3[%c0_11, %c0_12, %c0_13], %28 {strides = array<i32>} : memref<1x32x256xf32, #tpu.memory_space<vmem>>, vector<1x32x256xf32>,
    return
  }
  func.func @transform_0(%arg0: i32) -> (i32, i32, i32) {
    %c0_i32 = arith.constant 0 : i32
    %c0_i32_0 = arith.constant 0 : i32
    %c0_i32_1 = arith.constant 0 : i32
    return %arg0, %c0_i32, %c0_i32_0 : i32, i32, i32
  }
  func.func @transform_1(%arg0: i32) -> (i32, i32, i32) {
    %c0_i32 = arith.constant 0 : i32
    %c0_i32_0 = arith.constant 0 : i32
    %c0_i32_1 = arith.constant 0 : i32
    %c0_i32_2 = arith.constant 0 : i32
    return %c0_i32, %c0_i32_0, %c0_i32_1 : i32, i32, i32
  }
  func.func @transform_2(%arg0: i32) -> (i32, i32, i32) {
    %c0_i32 = arith.constant 0 : i32
    %c0_i32_0 = arith.constant 0 : i32
    %c0_i32_1 = arith.constant 0 : i32
    return %arg0, %c0_i32, %c0_i32_0 : i32, i32, i32
  }
}

</mosaic_0001>

<bundles_post_ra>
// kernel: tpu_custom_call.1
= control target key start
LH: loop header
LB: loop body
LE: loop exit
PB: predicated region body
PF: predicated region fallthrough
CT: control target
= control target key end

     0   :  { %7 = vsyncpa [#allocation3], 0  ;;  %s789_s0 = inlined_call_operand.hbm [shape: f32[2,32,256], index: 0, kind: input, shape index: {}]   ;;  %s790_s1 = inlined_call_operand.vmem [shape: f32[1,32,1], index: 1, kind: input, shape index: {}]   ;;  %s791_s2 = inlined_call_operand.hbm [shape: f32[2,32,256], index: 2, kind: output, shape index: {}]  }
   0x1   :  { %9 = vsyncpa [#allocation3 + $0x1], 0 }
   0x2   :  { %10 = vsyncpa [#allocation4], 0 }
   0x3   :  { %12 = vsyncpa [#allocation4 + $0x1], 0  ;;  %s571_s9 = smov 0   ;;  %s573_s10 = smov 0  }
   0x4   :  { %s575_s11 = smov 0   ;;  %s577_s12 = smov 0  }
   0x5 LB: > { %s592_s13 = sadd.s32 4294967295, %s547_s12   ;;  %s376_s14 = sadd.s32 4294967294, %s547_s12   ;;  %s547_s12 = sphi %s577_s12, %s804_s12   ;;  %s543_s11 = sphi %s575_s11, %s803_s11   ;;  %s539_s10 = sphi %s573_s10, %s802_s10   ;;  %s535_s9 = sphi %s571_s9, %s801_s9  }
   0x6   : > { %s596_s15 = sadd.s32 1, %s547_s12   ;;  %s25_s16 = sadd.s32 1, %s543_s11 }
   0x7   : > { %s22_s17 = ssub.s32 %s547_s12, %s596_s15  ;;  %p32_p0 = scmp.ne.s32.totalorder %s543_s11, %s539_s10 }
   0x8   : > { %p23_p1 = scmp.eq.s32.totalorder %s22_s17, 0  ;;  %p33_p2 = scmp.eq.s32.totalorder %s547_s12, 0 }
   0x9   : > { %p38_p3 = scmp.ne.s32.totalorder %s539_s10, %s535_s9  ;;  %p39_p4 = scmp.eq.s32.totalorder %s592_s13, 0 }
   0xa   : > { %s608_s18 = scalar_select %p23_p1, %s543_s11, %s25_s16  }
   0xb   : > { %p610_p5 = por %p33_p2, %p32_p0  ;;  %p614_p6 = por %p39_p4, %p38_p3 }
   0xc   : > { %p83_p7 = scmp.eq.s32.totalorder %s592_s13, 1  ;;  %p89_p8 = scmp.eq.s32.totalorder %s376_s14, 1 }
   0xd   : > { %p404_p10 = scmp.lt.s32.totalorder %s547_s12, 2  ;;  %s112_s23 = sand.u32 1, %s543_s11  }
   0xe   : > { %p621_p11 = por %p83_p7, %p32_p0  ;;  %p625_p12 = por %p89_p8, %p38_p3 }
   0xf   : > { %s390_s24 = sshll.u32 %s547_s12, 10  ;;  %s379_s25 = sshll.u32 %s112_s23, 6 }
  0x10   : > { %s795_s21 = scalar_select %p621_p11, 1, 0 }
  0x11   : > { %s796_s22 = scalar_select %p625_p12, 1, 0 }
  0x12   : > { %s634_s28 = scalar_lea.hbm %s789_s0, %s390_s24  ;;  %s116_s29 = scalar_lea.vmem [#allocation2], %s379_s25 }
  0x13   : > { %s123_s30 = sshll.u32 %s116_s29, 4  ;;  %p638_p13 = pnand %p404_p10, %p610_p5  ;;  %s642_s30 = int_to_ptr.vmem [resolvable:$true] %s123_s30 }
  0x14   : > { %s644_s4 = scalar_lea.sflag [#allocation3], %s112_s23  ;;  %s451_s5 = scalar_lea.hbm %s634_s28, 1024 }
  0x15   : > { %p452_p0 = scmp.ne.s32.totalorder %s634_s28, %s451_s5  ;;  %p453_p1 = pneg %p638_p13 }
  0x16   : > { %s456_s8 = scalar_lea.hbm %s789_s0, 2048  ;;  %p457_p4 = scmp.lt.u32.totalorder %s634_s28, %s789_s0 }
  0x17   : > { %p454_p2 = pnand %p453_p1, %p452_p0  ;;  %p458_p5 = scmp.lt.u32.totalorder %s456_s8, %s451_s5 }
  0x18   : > { %p460_p8 = scmp.lt.u32.totalorder %s451_s5, %s634_s28 }
  0x19   : > { %p455_p3 = pneg %p454_p2  ;;  %p459_p7 = por %p458_p5, %p457_p4 }
  0x1b   : > { %p461_p10 = por %p460_p8, %p459_p7 }
  0x1d   : > { %p462_p9 = pnand %p461_p10, %p455_p3 }
  0x1f   : > { %465 = shalt.err (!%p462_p9)
}
  0x20   : > { %s466_s17 = scalar_lea.vmem %s642_s30, 1024  ;;  %s549_s19 = smov [#allocation2]  }
  0x21   : > { %p467_p0 = scmp.ne.s32.totalorder %s642_s30, %s466_s17  ;;  %s471_s23 = sshll.u32 %s549_s19, 4  ;;  %s472_s23 = int_to_ptr.vmem [resolvable:$false] %s471_s23 }
  0x22   : > { %s473_s24 = scalar_lea.vmem %s472_s23, 2048  ;;  %p474_p11 = scmp.lt.s32.totalorder %s642_s30, %s472_s23 }
  0x23   : > { %p469_p2 = pnand %p467_p0, %p453_p1  ;;  %p475_p4 = scmp.lt.s32.totalorder %s473_s24, %s466_s17 }
  0x25   : > { %p470_p12 = pneg %p469_p2  ;;  %p476_p5 = por %p475_p4, %p474_p11 }
  0x27   : > { %p477_p7 = pnand %p476_p5, %p470_p12 }
  0x29   : > { %480 = shalt.err (!%p477_p7)
}
  0x2a   : > { %s550_s25 = smov 256   ;;  %s551_s26 = smov 16  }
  0x2b   : > { %399 = dma.hbm_to_vmem [thread:$0]  (!%p638_p13), %s634_s28, 1024, %s642_s30, %s644_s4, %s550_s25, %s550_s25, %s551_s26  }
  0x2c   : > { %p382_p9 = scmp.ge.s32.totalorder %s547_s12, 1  ;;  %p131_p1 = scmp.lt.s32.totalorder %s547_s12, 3 }
  0x2e   : > { %p132_p3 = pnand %p382_p9, %p131_p1 }
  0x2f   : > { %s675_s27 = sand.u32 (!%p132_p3), 1, %s539_s10  }
  0x30   : > { %135 = sbr.rel (%p132_p3) target bundleno = 552 (0x228), region = 28  ;;  %s383_s29 = sshll.u32 (!%p132_p3), %s675_s27, 6 }
  0x31   : > { %s138_s5 = scalar_lea.sflag (!%p132_p3), [#allocation3], %s675_s27  ;;  %s141_s6 = scalar_lea.vmem (!%p132_p3), [#allocation2], %s383_s29 }
  0x37   : > { %526 = dma.done.wait (%p614_p6), %s138_s5, 1024  }
  0x38   : > { %528 = vsyncadd (%p614_p6), %s138_s5, 4294966272  ;;  %v552_v0 = vmov 0   ;;  %v172_v1 = vld [vmem:[%s790_s1 + $0x10] sm:$0xff]  ;;  %v170_v2 = vld [vmem:[%s790_s1] sm:$0xff]  ;;  %s391_s16 = sshll.u32 %s592_s13, 10  ;;  %s161_s17 = scalar_lea.vmem [#allocation5], %s383_s29 }
  0x39   : > { %444 = vset.pattern.permute.xlu1 %v552_v0  ;;  %443 = vset.pattern.permute.xlu0 %v552_v0  ;;  %v173_v3 = vld [vmem:[%s790_s1 + $0x18] sm:$0xff]  ;;  %v171_v4 = vld [vmem:[%s790_s1 + $0x8] sm:$0xff]  ;;  %v697_v7 = vld [vmem:[%s141_s6] sm:$0xff]  ;;  %s303_s19 = sshll.u32 %s161_s17, 4  ;;  %s739_s24 = scalar_lea.hbm %s791_s2, %s391_s16  ;;  %s741_s19 = int_to_ptr.vmem [resolvable:$true] %s303_s19 }
  0x3a   : > { %186 = vperm.xlu1 %444, %v172_v1   ;;  %176 = vperm.xlu0 %443, %v170_v2   ;;  %v699_v8 = vld [vmem:[%s141_s6 + $0x8] sm:$0xff]  ;;  %v701_v9 = vld [vmem:[%s141_s6 + $0x10] sm:$0xff]  ;;  %v703_v10 = vld [vmem:[%s141_s6 + $0x18] sm:$0xff]  ;;  %s290_s25 = scalar_lea.sflag [#allocation4], %s675_s27  ;;  %s481_s26 = scalar_lea.vmem %s741_s19, 1024 }
  0x3b   : > { %v705_v11 = vld [vmem:[%s141_s6 + $0x20] sm:$0xff]  ;;  %v707_v12 = vld [vmem:[%s141_s6 + $0x28] sm:$0xff]  ;;  %v713_v19 = vld [vmem:[%s141_s6 + $0x30] sm:$0xff]  ;;  %p482_p6 = scmp.ne.s32.totalorder %s741_s19, %s481_s26  ;;  %p798_p11 = scmp.ne.s32.totalorder %s795_s21, 0 }
  0x3c   : > { %v715_v20 = vld [vmem:[%s141_s6 + $0x38] sm:$0xff]  ;;  %s553_s29 = smov [#allocation5]  }
  0x3d   : > { %p483_p12 = pnand %p482_p6, %p798_p11  ;;  %s485_s5 = sshll.u32 %s553_s29, 4  ;;  %s486_s5 = int_to_ptr.vmem [resolvable:$false] %s485_s5 }
  0x3e   : > { %191 = vperm.xlu1 %444, %v173_v3   ;;  %181 = vperm.xlu0 %443, %v171_v4   ;;  %s487_s6 = scalar_lea.vmem %s486_s5, 2048  ;;  %p488_p8 = scmp.lt.s32.totalorder %s741_s19, %s486_s5 }
  0x3f   : > { %p484_p13 = pneg %p483_p12  ;;  %p489_p10 = scmp.lt.s32.totalorder %s487_s6, %s481_s26 }
  0x41   : > { %p490_p0 = por %p489_p10, %p488_p8 }
  0x43   : > { %p491_p2 = pnand %p490_p0, %p484_p13 }
  0xb9   : > { %v187_v5 = vpop.permute.xlu1 %186  ;;  %v177_v6 = vpop.permute.xlu0 %176 }
  0xba   : > { %v194_v14 = vmul.f32 %v177_v6, %v697_v7  ;;  %v195_v15 = vmul.f32 %v177_v6, %v699_v8  ;;  %v198_v21 = vmul.f32 %v187_v5, %v705_v11  ;;  %v199_v22 = vmul.f32 %v187_v5, %v707_v12 }
  0xbd   : > { %v182_v13 = vpop.permute.xlu0 %181  ;;  %v192_v18 = vpop.permute.xlu1 %191 }
  0xbe   : > { %v196_v16 = vmul.f32 %v182_v13, %v701_v9  ;;  %v197_v17 = vmul.f32 %v182_v13, %v703_v10  ;;  %v200_v25 = vmul.f32 %v192_v18, %v713_v19  ;;  %v201_v26 = vmul.f32 %v192_v18, %v715_v20 }
  0xc0   : > { %v202_v23 = vadd.f32 %v196_v16, %v194_v14  ;;  %v211_v24 = vadd.f32 %v197_v17, %v195_v15 }
  0xc2   : > { %v203_v27 = vadd.f32 %v202_v23, %v198_v21  ;;  %v212_v28 = vadd.f32 %v211_v24, %v199_v22 }
  0xc4   : > { %v204_v29 = vadd.f32 %v203_v27, %v200_v25  ;;  %v213_v30 = vadd.f32 %v212_v28, %v201_v26 }
  0xc6   : > { %v205_v31 = vrot.slane %v204_v29, 4  ;;  %v214_v32 = vrot.slane %v213_v30, 4 }
  0xc8   : > { %v206_v33 = vadd.f32 %v205_v31, %v204_v29  ;;  %v215_v34 = vadd.f32 %v214_v32, %v213_v30 }
  0xca   : > { %v207_v35 = vrot.slane %v206_v33, 2  ;;  %v216_v36 = vrot.slane %v215_v34, 2 }
  0xcc   : > { %v208_v37 = vadd.f32 %v207_v35, %v206_v33  ;;  %v217_v38 = vadd.f32 %v216_v36, %v215_v34 }
  0xce   : > { %v209_v39 = vrot.slane %v208_v37, 1  ;;  %v218_v40 = vrot.slane %v217_v38, 1 }
  0xd0   : > { %v210_v41 = vadd.f32 %v209_v39, %v208_v37  ;;  %v219_v42 = vadd.f32 %v218_v40, %v217_v38 }
  0xd2   : > { %v220_v43 = vmax.f32 %v210_v41, %v219_v42 }
  0xd4   : > { %221 = vmax.xlane.f32.xlu0 %v220_v43 }
 0x161   : > { %v222_v44 = vpop.xlane.xlu0 %221 }
 0x162   : > { %v223_v45 = vsub.f32 %v210_v41, %v222_v44  ;;  %v224_v46 = vsub.f32 %v219_v42, %v222_v44 }
 0x164   : > { %v225_v47 = vmul.f32 1.442695, %v223_v45  ;;  %v227_v48 = vmul.f32 1.442695, %v224_v46 }
 0x166   : > { %445 = vpow2.f32 %v225_v47 }
 0x167   : > { %447 = vpow2.f32 %v227_v48 }
 0x170   : > { %v446_v49 = vpop.eup %445 }
 0x171   : > { %v448_v50 = vpop.eup %447  ;;  %v232_v51 = vmul.f32 %v446_v49, %v697_v7  ;;  %v236_v54 = vmul.f32 %v446_v49, %v705_v11  ;;  %v234_v57 = vmul.f32 %v446_v49, %v701_v9  ;;  %v238_v61 = vmul.f32 %v446_v49, %v713_v19 }
 0x172   : > { %v229_v52 = vadd.f32 %v448_v50, %v446_v49  ;;  %v233_v53 = vmul.f32 %v448_v50, %v699_v8  ;;  %v237_v55 = vmul.f32 %v448_v50, %v707_v12  ;;  %v235_v58 = vmul.f32 %v448_v50, %v703_v10 }
 0x173   : > { %v239_v62 = vmul.f32 %v448_v50, %v715_v20 }
 0x174   : > { %230 = vadd.xlane.f32.xlu1 %v229_v52  ;;  %v240_v56 = vadd.f32 %v233_v53, %v232_v51  ;;  %v246_v59 = vadd.f32 %v237_v55, %v236_v54  ;;  %v243_v60 = vadd.f32 %v235_v58, %v234_v57 }
 0x175   : > { %v249_v63 = vadd.f32 %v239_v62, %v238_v61 }
 0x176   : > { %241 = vadd.xlane.f32.xlu0 %v240_v56 }
 0x178   : > { %247 = vadd.xlane.f32.xlu1 %v246_v59 }
 0x17a   : > { %244 = vadd.xlane.f32.xlu0 %v243_v60 }
 0x17e   : > { %250 = vadd.xlane.f32.xlu0 %v249_v63 }
 0x201   : > { %v231_v0 = vpop.xlane.xlu1 %230 }
 0x202   : > { %449 = vrcp.f32 %v231_v0 }
 0x203   : > { %v242_v1 = vpop.xlane.xlu0 %241 }
 0x205   : > { %v248_v5 = vpop.xlane.xlu1 %247 }
 0x207   : > { %v245_v2 = vpop.xlane.xlu0 %244 }
 0x20b   : > { %v251_v3 = vpop.xlane.xlu0 %250 }
 0x20c   : > { %v450_v4 = vpop.eup %449 }
 0x20d   : > { %v253_v6 = vmul.f32 %v450_v4, %v242_v1  ;;  %v255_v13 = vmul.f32 %v450_v4, %v248_v5  ;;  %v254_v14 = vmul.f32 %v450_v4, %v245_v2  ;;  %v256_v15 = vmul.f32 %v450_v4, %v251_v3 }
 0x20f   : > { %vm257_vm0 = vcmp.gt.f32.partialorder %v253_v6, 0.0  ;;  %v261_v16 = vmul.f32 0.01, %v253_v6  ;;  %vm259_vm1 = vcmp.gt.f32.partialorder %v255_v13, 0.0  ;;  %v263_v17 = vmul.f32 0.01, %v255_v13 }
 0x210   : > { %vm258_vm2 = vcmp.gt.f32.partialorder %v254_v14, 0.0  ;;  %v262_v18 = vmul.f32 0.01, %v254_v14  ;;  %vm260_vm3 = vcmp.gt.f32.partialorder %v256_v15, 0.0  ;;  %v264_v21 = vmul.f32 0.01, %v256_v15 }
 0x211   : > { %v265_v22 = vsel %vm257_vm0, %v253_v6, %v261_v16  ;;  %v267_v23 = vsel %vm259_vm1, %v255_v13, %v263_v17 }
 0x212   : > { %v269_v24 = vmul.f32 0.1, %v265_v22  ;;  %v271_v25 = vmul.f32 0.1, %v267_v23  ;;  %v266_v26 = vsel %vm258_vm2, %v254_v14, %v262_v18  ;;  %v268_v27 = vsel %vm260_vm3, %v256_v15, %v264_v21 }
 0x213   : > { %v270_v28 = vmul.f32 0.1, %v266_v26  ;;  %v272_v29 = vmul.f32 0.1, %v268_v27 }
 0x214   : > { %v273_v30 = vadd.f32 %v269_v24, %v697_v7  ;;  %v274_v31 = vadd.f32 %v269_v24, %v699_v8  ;;  %v277_v32 = vadd.f32 %v271_v25, %v705_v11  ;;  %v278_v33 = vadd.f32 %v271_v25, %v707_v12 }
 0x215   : > { %v275_v34 = vadd.f32 %v270_v28, %v701_v9  ;;  %v276_v7 = vadd.f32 %v270_v28, %v703_v10  ;;  %v279_v8 = vadd.f32 %v272_v29, %v713_v19  ;;  %v280_v11 = vadd.f32 %v272_v29, %v715_v20 }
 0x216   : > { %281 = vst [vmem:[%s161_s17] sm:$0xff] %v273_v30  ;;  %282 = vst [vmem:[%s161_s17 + $0x8] sm:$0xff] %v274_v31 }
 0x217   : > { %285 = vst [vmem:[%s161_s17 + $0x20] sm:$0xff] %v277_v32  ;;  %286 = vst [vmem:[%s161_s17 + $0x28] sm:$0xff] %v278_v33 }
 0x218   : > { %283 = vst [vmem:[%s161_s17 + $0x10] sm:$0xff] %v275_v34  ;;  %284 = vst [vmem:[%s161_s17 + $0x18] sm:$0xff] %v276_v7 }
 0x219   : > { %287 = vst [vmem:[%s161_s17 + $0x30] sm:$0xff] %v279_v8  ;;  %288 = vst [vmem:[%s161_s17 + $0x38] sm:$0xff] %v280_v11 }
 0x21a   : > { %494 = shalt.err (!%p491_p2)
}
 0x21b   : > { %s495_s28 = scalar_lea.hbm %s739_s24, 1024  ;;  %s499_s4 = scalar_lea.hbm %s791_s2, 2048 }
 0x21c   : > { %p496_p4 = scmp.ne.s32.totalorder %s739_s24, %s495_s28  ;;  %p500_p9 = scmp.lt.u32.totalorder %s739_s24, %s791_s2 }
 0x21d   : > { %p501_p1 = scmp.lt.u32.totalorder %s499_s4, %s495_s28  ;;  %p503_p6 = scmp.lt.u32.totalorder %s495_s28, %s739_s24 }
 0x21e   : > { %p497_p5 = pnand %p496_p4, %p798_p11 }
 0x21f   : > { %p502_p3 = por %p501_p1, %p500_p9 }
 0x220   : > { %p498_p7 = pneg %p497_p5 }
 0x221   : > { %p504_p12 = por %p503_p6, %p502_p3 }
 0x223   : > { %p505_p13 = pnand %p504_p12, %p498_p7 }
 0x225   : > { %508 = shalt.err (!%p505_p13)
}
 0x226   : > { %s554_s14 = smov 256   ;;  %s555_s20 = smov 16  }
 0x227   : > { %394 = dma.vmem_to_hbm [thread:$0]  (%p798_p11), %s741_s19, 1024, %s739_s24, %s290_s25, %s554_s14, %s554_s14, %s555_s20  }
 0x228 PF: > { %s318_s16 = sand.u32 1, %s535_s9   ;;  %p799_p8 = scmp.ne.s32.totalorder %s796_s22, 0 }
 0x229   : > { %p800_p10 = scmp.ge.s32.totalorder %s547_s12, 2  ;;  %s319_s17 = scalar_lea.sflag [#allocation4], %s318_s16 }
 0x22b   : > { %p401_p0 = pnand %p800_p10, %p799_p8 }
 0x22d   : > { %530 = dma.done.wait (!%p401_p0), %s319_s17, 1024  }
 0x22e   : > { %532 = vsyncadd (!%p401_p0), %s319_s17, 4294966272  ;;  %p15_p2 = scmp.ge.s32.totalorder %s596_s15, 4   ;;  %s801_s9 = smov %s539_s10 }
 0x22f   : > { %s802_s10 = smov %s543_s11  ;;  %s803_s11 = smov %s608_s18 }
 0x230   : > { %s804_s12 = smov %s596_s15  ;;  %17 = sbr.rel (!%p15_p2) target bundleno = 5 (0x5), region = 73 }
 0x237   :  { %324 = vsyncpa [#allocation3], 1 }
 0x238   :  { %326 = vsyncpa [#allocation3 + $0x1], 1 }
 0x239   :  { %327 = vsyncpa [#allocation4], 1 }
 0x23a   :  { %329 = vsyncpa [#allocation4 + $0x1], 1 }

</bundles_post_ra>
